<compile_context>
chip_gen: v5e
topology: v5e:2x2
jax: 0.10.0
libtpu: 0.0.40
codegen_flags: <defaults>
</compile_context>

<pallas_src>
import math

import jax
import jax.numpy as jnp
from jax.experimental import pallas as pl
from jax.experimental.pallas import tpu as pltpu


def build_positional_encoding_table(d_model: int, max_len: int = 512) -> jnp.ndarray:
    """Deterministic sinusoidal table, identical to the PyTorch __init__."""
    position = jnp.arange(0, max_len, dtype=jnp.float32)[:, None]            # (max_len, 1)
    div_term = jnp.exp(
        jnp.arange(0, d_model, 2, dtype=jnp.float32) * (-math.log(10000.0) / d_model)
    )                                                                         # (ceil(d/2),)
    angles = position * div_term                                              # (max_len, ceil(d/2))
    pe = jnp.zeros((max_len, d_model), dtype=jnp.float32)
    pe = pe.at[:, 0::2].set(jnp.sin(angles))
    pe = pe.at[:, 1::2].set(jnp.cos(angles)[:, : d_model // 2])
    return pe[None, :, :]                                                     # (1, max_len, d_model)


def _pos_enc_add_kernel(x_ref, pe_ref, o_ref):
    # x_ref: (row_tile, col_tile); pe_ref: (1, col_tile) — broadcast over rows on the VPU.
    o_ref[...] = (x_ref[...] + pe_ref[...]).astype(o_ref.dtype)


# ----------------------------- tiling policy ---------------------------------

_TARGET_BLOCK_BYTES = 4 << 20        # ~4 MiB blocks: per-step overhead ~5% on v6e/v7x
_VMEM_SOFT_LIMIT_BYTES = 28 << 20    # keep pipeline footprint well under v7x 64 MiB/TC
_SMALL_INPUT_BYTES = 2 << 20         # below this, XLA's fused add beats a kernel launch

# Sub-32-bit dtypes pack along sublanes: dense row-tile granularity per itemsize.
_SUBLANE_GRAN = {1: 32, 2: 16, 4: 8, 8: 8}


def _round_up(v: int, m: int) -> int:
    return ((v + m - 1) // m) * m


def _round_down(v: int, m: int) -> int:
    return (v // m) * m


def _pick_tiles(B: int, L: int, itemsize: int):
    gran = _SUBLANE_GRAN.get(itemsize, 8)
    col_cap = max(128, _round_down(_TARGET_BLOCK_BYTES // (gran * itemsize), 128))
    if L < 128:
        col_tile = L                                   # full extent (always legal)
    else:
        col_tile = min(col_cap, _round_down(L, 128))   # ragged tail handled by cdiv grid
    row_cap = max(gran, _round_down(_TARGET_BLOCK_BYTES // (col_tile * itemsize), gran))
    if B < gran:
        row_tile = B                                   # full extent (always legal)
    else:
        row_tile = min(row_cap, _round_down(B, gran))
    return row_tile, col_tile, gran


def _maybe_split_for_megacore(B: int, L: int, row_tile: int, col_tile: int, gran: int):
    """Guarantee >=2 grid blocks so v7x megacore can use both TensorCores."""
    n_col = pl.cdiv(L, col_tile)
    n_row = pl.cdiv(B, row_tile)
    if n_col * n_row >= 2:
        return row_tile, col_tile
    if col_tile >= 256:                                # split columns (keeps pe resident over rows)
        col_tile = max(128, min(col_tile, _round_up(pl.cdiv(L, 2), 128)))
    elif B >= 2 * gran and row_tile >= 2 * gran:       # otherwise split rows if possible
        row_tile = max(gran, min(row_tile, _round_up(pl.cdiv(B, 2), gran)))
    return row_tile, col_tile


def _footprint_bytes(row_tile: int, col_tile: int, gran: int, itemsize: int) -> int:
    """Honest double-buffered VMEM footprint, including sublane padding."""
    padded_rows = _round_up(row_tile, gran)
    x_and_out = 2 * 2 * padded_rows * col_tile * itemsize   # x + out, double-buffered
    pe_rows = gran                                          # (1, col_tile) pads to one sublane group
    pe = 2 * pe_rows * col_tile * itemsize
    return x_and_out + pe


# --------------------------------- forward -----------------------------------

def positional_encoding_forward(x: jnp.ndarray, pe: jnp.ndarray, *,
                                force_pallas: bool = False,
                                donate_x: bool = False) -> jnp.ndarray:
    """x: (B, S, D); pe: (1, max_len, D) float32 table. Returns x + pe[:, :S, :]."""
    B, S, D = x.shape
    pe_slice = pe[:, :S, :].astype(x.dtype)      # static slice + dtype match, glue outside kernel

    itemsize = jnp.dtype(x.dtype).itemsize
    total_bytes = B * S * D * itemsize
    if total_bytes < _SMALL_INPUT_BYTES and not force_pallas:
        # Small-input fast path: kernel bring-up + per-step overhead dominates here;
        # XLA fuses this broadcast add at roofline.
        return x + pe_slice

    # Lane-dense flattening: (B, S, D) -> (B, S*D) so the last dim is >= 128-wide.
    L = S * D
    x_flat = x.reshape(B, L)
    pe_flat = pe_slice.reshape(1, L)

    row_tile, col_tile, gran = _pick_tiles(B, L, itemsize)
    row_tile, col_tile = _maybe_split_for_megacore(B, L, row_tile, col_tile, gran)

    # Shrink tiles until the real (padded, double-buffered) footprint fits.
    while (_footprint_bytes(row_tile, col_tile, gran, itemsize) > _VMEM_SOFT_LIMIT_BYTES
           and (col_tile > 128 or row_tile > gran)):
        if col_tile > 128:
            col_tile = max(128, _round_down(col_tile // 2, 128))
        else:
            row_tile = max(gran, _round_down(row_tile // 2, gran))

    n_col = pl.cdiv(L, col_tile)
    n_row = pl.cdiv(B, row_tile)

    footprint = _footprint_bytes(row_tile, col_tile, gran, itemsize)
    # Explicit VMEM budget: independent of the 16/32/32 MiB scoped defaults,
    # generous headroom, well within every generation's physical VMEM.
    vmem_limit = min(max(footprint + (8 << 20), 16 << 20), 40 << 20)

    out_flat = pl.pallas_call(
        _pos_enc_add_kernel,
        out_shape=jax.ShapeDtypeStruct((B, L), x.dtype),
        grid_spec=pltpu.PrefetchScalarGridSpec(
            num_scalar_prefetch=0,
            # Row axis innermost: the pe block index is constant across it, so the
            # pe tile stays resident in VMEM instead of being re-DMA'd every step.
            grid=(n_col, n_row),
            in_specs=[
                pl.BlockSpec((row_tile, col_tile), lambda c, r: (r, c)),   # x tile
                pl.BlockSpec((1, col_tile), lambda c, r: (0, c)),          # pe row (batch-broadcast)
            ],
            out_specs=pl.BlockSpec((row_tile, col_tile), lambda c, r: (r, c)),
        ),
        compiler_params=pltpu.CompilerParams(
            dimension_semantics=("parallel", "parallel"),
            vmem_limit_bytes=vmem_limit,
        ),
        input_output_aliases=({0: 0} if donate_x else {}),
    )(x_flat, pe_flat)

    return out_flat.reshape(B, S, D)


if __name__ == "__main__":
    d_model = 32
    max_len = 512

    pe = build_positional_encoding_table(d_model, max_len)
    k0, k1, k2 = jax.random.split(jax.random.PRNGKey(0), 3)

    # Case 1: tPatchGNN-scale tiny input -> small-input fast path (XLA fused add).
    x_small = jax.random.normal(k0, (2, 8, d_model), dtype=jnp.float32)
    out_small = jax.block_until_ready(positional_encoding_forward(x_small, pe))
    ref_small = x_small + pe[:, :8, :]
    assert out_small.shape == (2, 8, d_model)
    assert jnp.allclose(out_small, ref_small, atol=1e-6, rtol=1e-6)

    # Case 2: same tiny scale forced onto the Pallas path, with a ragged column
    # boundary (S=9 -> L=288 = 256 + 32-wide padded tail block).
    x_ragged = jax.random.normal(k1, (2, 9, d_model), dtype=jnp.float32)
    out_ragged = jax.block_until_ready(
        positional_encoding_forward(x_ragged, pe, force_pallas=True))
    ref_ragged = x_ragged + pe[:, :9, :]
    assert jnp.allclose(out_ragged, ref_ragged, atol=1e-6, rtol=1e-6)

    # Case 3: larger shape that takes the natural Pallas path with multi-block
    # tiling and a ragged row boundary (B=70 not a multiple of 8).
    x_large = jax.random.normal(k2, (70, 300, d_model), dtype=jnp.float32)
    out_large = jax.block_until_ready(positional_encoding_forward(x_large, pe))
    ref_large = x_large + pe[:, :300, :]
    assert jnp.allclose(out_large, ref_large, atol=1e-6, rtol=1e-6)

    # Case 4: bf16 activations exercise the dtype-aware (16-sublane) row tiling.
    x_bf16 = x_large.astype(jnp.bfloat16)
    out_bf16 = jax.block_until_ready(positional_encoding_forward(x_bf16, pe))
    ref_bf16 = x_bf16 + pe[:, :300, :].astype(jnp.bfloat16)
    assert out_bf16.dtype == jnp.bfloat16
    assert jnp.allclose(out_bf16.astype(jnp.float32), ref_bf16.astype(jnp.float32),
                        atol=1e-2, rtol=1e-2)

    print("KERNEL_OK")
</pallas_src>

<mosaic_0001>
module attributes {stable_mosaic.version = 11 : i64} {
  func.func @_pos_enc_add_kernel(%arg0: i32, %arg1: i32, %arg2: memref<2x256xf32, #tpu.memory_space<vmem>>, %arg3: memref<1x256xf32, #tpu.memory_space<vmem>>, %arg4: memref<2x256xf32, #tpu.memory_space<vmem>>) attributes {dimension_semantics = [#tpu.dimension_semantics<parallel>, #tpu.dimension_semantics<parallel>], iteration_bounds = array<i64: 2, 1>, scalar_prefetch = 0 : i64, scratch_operands = 0 : i64, tpu.core_type = #tpu.core_type<tc>, window_params = [{transform_indices = @transform_0, window_bounds = array<i64: 2, 256>}, {transform_indices = @transform_1, window_bounds = array<i64: 1, 256>}, {transform_indices = @transform_2, window_bounds = array<i64: 2, 256>}]} {
    %c0 = arith.constant 0 : index
    %c0_0 = arith.constant 0 : index
    %0 = vector.load %arg2[%c0, %c0_0] : memref<2x256xf32, #tpu.memory_space<vmem>>, vector<2x256xf32>
    %c0_1 = arith.constant 0 : index
    %c0_2 = arith.constant 0 : index
    %1 = vector.load %arg3[%c0_1, %c0_2] : memref<1x256xf32, #tpu.memory_space<vmem>>, vector<1x256xf32>
    %2 = vector.broadcast %1 : vector<1x256xf32> to vector<2x256xf32>
    %3 = arith.addf %0, %2 : vector<2x256xf32>
    %c0_3 = arith.constant 0 : index
    %c0_4 = arith.constant 0 : index
    %4 = vector.load %arg4[%c0_3, %c0_4] : memref<2x256xf32, #tpu.memory_space<vmem>>, vector<2x256xf32>
    tpu.vector_store %arg4[%c0_3, %c0_4], %3 {strides = array<i32>} : memref<2x256xf32, #tpu.memory_space<vmem>>, vector<2x256xf32>,
    return
  }
  func.func @transform_0(%arg0: i32, %arg1: i32) -> (i32, i32) {
    %c0_i32 = arith.constant 0 : i32
    return %arg1, %arg0 : i32, i32
  }
  func.func @transform_1(%arg0: i32, %arg1: i32) -> (i32, i32) {
    %c0_i32 = arith.constant 0 : i32
    %c0_i32_0 = arith.constant 0 : i32
    return %c0_i32, %arg0 : i32, i32
  }
  func.func @transform_2(%arg0: i32, %arg1: i32) -> (i32, i32) {
    %c0_i32 = arith.constant 0 : i32
    return %arg1, %arg0 : i32, i32
  }
}

</mosaic_0001>

<bundles_post_ra>
// kernel: tpu_custom_call.1
= control target key start
LH: loop header
LB: loop body
LE: loop exit
PB: predicated region body
PF: predicated region fallthrough
CT: control target
= control target key end

     0   :  { %7 = vsyncpa [#allocation3], 0  ;;  %s872_s0 = inlined_call_operand.hbm [shape: f32[2,288], index: 0, kind: input, shape index: {}]   ;;  %s873_s1 = inlined_call_operand.hbm [shape: f32[1,288], index: 1, kind: input, shape index: {}]   ;;  %s874_s2 = inlined_call_operand.hbm [shape: f32[2,288], index: 2, kind: output, shape index: {}]  }
   0x1   :  { %9 = vsyncpa [#allocation3 + $0x1], 0 }
   0x2   :  { %10 = vsyncpa [#allocation6], 0 }
   0x3   :  { %12 = vsyncpa [#allocation6 + $0x1], 0 }
   0x4   :  { %13 = vsyncpa [#allocation4], 0 }
   0x5   :  { %15 = vsyncpa [#allocation4 + $0x1], 0  ;;  %s669_s9 = smov 0   ;;  %s671_s10 = smov 0  }
   0x6   :  { %s673_s11 = smov 0   ;;  %s675_s12 = smov 0  }
   0x7   :  { %s677_s13 = smov 0   ;;  %s679_s14 = smov 0  }
   0x8 LB: > { %s389_s15 = sadd.s32 4294967295, %s649_s14   ;;  %s390_s16 = sadd.s32 4294967294, %s649_s14   ;;  %s649_s14 = sphi %s679_s14, %s21_s14   ;;  %s645_s13 = sphi %s677_s13, %s890_s13   ;;  %s641_s12 = sphi %s675_s12, %s889_s12   ;;  %s637_s11 = sphi %s673_s11, %s888_s11   ;;  %s633_s10 = sphi %s671_s10, %s887_s10   ;;  %s629_s9 = sphi %s669_s9, %s886_s9  }
   0x9   : > { %s33_s17 = sadd.s32 1, %s645_s13  ;;  %s42_s18 = sadd.s32 1, %s637_s11 }
   0xa   : > { %p35_p0 = scmp.ge.s32.totalorder %s33_s17, 2  ;;  %p49_p1 = scmp.ne.s32.totalorder %s637_s11, %s633_s10 }
   0xb   : > { %p50_p2 = scmp.eq.s32.totalorder %s649_s14, 0  ;;  %p55_p3 = scmp.ne.s32.totalorder %s633_s10, %s629_s9 }
   0xc   : > { %s892_s17 = smov (%p35_p0, %s33_s17), 0  ;;  %p56_p5 = scmp.eq.s32.totalorder %s389_s15, 0 }
   0xd   : > { %877 = sst [smem:[#allocation11_spill]] %s892_s17  ;;  %p710_p4 = por %p50_p2, %p49_p1 }
   0xe   : > { %s38_s20 = ssub.s32 %s645_s13, %s892_s17  ;;  %p107_p6 = scmp.eq.s32.totalorder %s389_s15, 1 }
   0xf   : > { %p40_p7 = scmp.eq.s32.totalorder %s38_s20, 0  ;;  %p716_p8 = por %p56_p5, %p55_p3 }
  0x10   : > { %p720_p9 = por %p107_p6, %p49_p1  ;;  %p113_p10 = scmp.eq.s32.totalorder %s390_s16, 1 }
  0x11   : > { %s725_s23 = scalar_select %p40_p7, %s637_s11, %s42_s18  }
  0x12   : > { %p727_p11 = por %p113_p10, %p55_p3  ;;  %p876_p12 = scmp.ge.s32.totalorder %s649_s14, 2 }
  0x14   : > { %129 = sbr.rel (%p876_p12) target bundleno = 94 (0x5e), region = 16 }
  0x19   : > { %132 = sbr.rel (!%p710_p4) target bundleno = 60 (0x3c), region = 20  ;;  %s133_s25 = sand.u32 (%p710_p4), 1, %s637_s11  }
  0x1a   : > { %s394_s26 = sshll.u32 (%p710_p4), %s645_s13, 1  ;;  %s393_s27 = sshll.u32 (%p710_p4), %s133_s25, 2 }
  0x1b   : > { %s139_s28 = ssub.s32 (%p710_p4), 3, %s394_s26  ;;  %s741_s4 = scalar_lea.sflag (%p710_p4), [#allocation3], %s133_s25 }
  0x1c   : > { %p140_p13 = scmp.lt.s32.totalorder (%p710_p4), %s139_s28, 2  ;;  %s137_s5 = scalar_lea.vmem (%p710_p4), [#allocation2], %s393_s27 }
  0x1e   : > { %s894_s28 = smov (!%p140_p13, %s139_s28), 2 }
  0x1f   : > { %s395_s29 = sshll.u32 %s894_s28, 1 }
  0x20   : > { %s143_s30 = ssub.s32 4, %s395_s29 }
  0x21   : > { %s144_s3 = sshll.u32 %s143_s30, 4 }
  0x22   : > { %145 = vsyncadd %s741_s4, %s144_s3  ;;  %p744_p0 = scmp.ne.s32.totalorder %s395_s29, 0  ;;  %s416_s7 = sshll.u32 %s645_s13, 2 }
  0x23   : > { %s150_s16 = scalar_lea.hbm %s872_s0, %s416_s7  ;;  %s399_s18 = sshll.u32 %s894_s28, 5 }
  0x24   : > { %s153_s20 = sshll.u32 %s150_s16, 4  ;;  %s155_s25 = sshll.u32 %s137_s5, 4  ;;  %s154_s20 = int_to_ptr.hbm [resolvable:$true] %s153_s20  ;;  %s156_s25 = int_to_ptr.vmem [resolvable:$true] %s155_s25 }
  0x25   : > { %s474_s26 = sshra.s32 %s154_s20, 4  ;;  %s476_s27 = sshrl.u32 %s399_s18, 4  ;;  %s475_s26 = int_to_ptr.hbm [resolvable:$true] %s474_s26 }
  0x26   : > { %s481_s30 = scalar_lea.hbm %s475_s26, %s476_s27  ;;  %s485_s17 = scalar_lea.hbm %s872_s0, 6 }
  0x27   : > { %p482_p1 = scmp.ne.s32.totalorder %s475_s26, %s481_s30  ;;  %p487_p5 = scmp.lt.s32.totalorder %s485_s17, %s481_s30 }
  0x29   : > { %p483_p2 = pnand %p482_p1, %p744_p0 }
  0x2b   : > { %p484_p3 = pneg %p483_p2 }
  0x2d   : > { %p489_p6 = pnand %p487_p5, %p484_p3 }
  0x2f   : > { %492 = shalt.err (!%p489_p6)
}
  0x30   : > { %s493_s7 = sshra.s32 %s156_s25, 4  ;;  %s651_s8 = smov [#allocation2]   ;;  %s494_s7 = int_to_ptr.vmem [resolvable:$true] %s493_s7 }
  0x31   : > { %s500_s5 = scalar_lea.vmem %s494_s7, %s476_s27  ;;  %s504_s15 = scalar_lea.vmem %s651_s8, 8 }
  0x32   : > { %p501_p7 = scmp.ne.s32.totalorder %s494_s7, %s500_s5  ;;  %p506_p12 = scmp.lt.s32.totalorder %s504_s15, %s500_s5 }
  0x34   : > { %p502_p10 = pnand %p501_p7, %p744_p0 }
  0x36   : > { %p503_p13 = pneg %p502_p10 }
  0x38   : > { %p508_p1 = pnand %p506_p12, %p503_p13 }
  0x3a   : > { %511 = shalt.err (!%p508_p1)
}
  0x3b   : > { %158 = dma.hbm_to_vmem [thread:$0]  (%p744_p0), %s154_s20, %s399_s18, %s156_s25, %s741_s4  }
  0x3c PF: > { %161 = sbr.rel (!%p710_p4) target bundleno = 94 (0x5e), region = 24  ;;  %s162_s17 = sand.u32 (%p710_p4), 1, %s637_s11  }
  0x3d   : > { %s401_s16 = sshll.u32 (%p710_p4), %s645_s13, 1  ;;  %s400_s26 = sshll.u32 (%p710_p4), %s162_s17, 1 }
  0x3e   : > { %s168_s27 = ssub.s32 (%p710_p4), 3, %s401_s16  ;;  %s774_s29 = scalar_lea.sflag (%p710_p4), [#allocation6], %s162_s17 }
  0x3f   : > { %p169_p2 = scmp.lt.s32.totalorder (%p710_p4), %s168_s27, 2  ;;  %s166_s28 = scalar_lea.vmem (%p710_p4), [#allocation5], %s400_s26 }
  0x41   : > { %s896_s27 = smov (!%p169_p2, %s168_s27), 2 }
  0x42   : > { %s171_s30 = ssub.s32 2, %s896_s27 }
  0x43   : > { %s172_s6 = sshll.u32 %s171_s30, 4 }
  0x44   : > { %173 = vsyncadd %s774_s29, %s172_s6  ;;  %p402_p4 = scmp.ne.s32.totalorder %s896_s27, 0  ;;  %s175_s18 = scalar_lea.hbm %s873_s1, %s401_s16 }
  0x45   : > { %s176_s20 = sshll.u32 %s896_s27, 4  ;;  %s177_s25 = sshll.u32 %s175_s18, 4  ;;  %s178_s25 = int_to_ptr.hbm [resolvable:$true] %s177_s25 }
  0x46   : > { %s179_s3 = sshll.u32 %s166_s28, 4  ;;  %s513_s7 = sshra.s32 %s178_s25, 4  ;;  %s180_s3 = int_to_ptr.vmem [resolvable:$true] %s179_s3  ;;  %s514_s7 = int_to_ptr.hbm [resolvable:$true] %s513_s7 }
  0x47   : > { %s515_s5 = sshrl.u32 %s176_s20, 4  ;;  %s524_s26 = scalar_lea.hbm %s873_s1, 3 }
  0x48   : > { %s520_s8 = scalar_lea.hbm %s514_s7, %s515_s5 }
  0x49   : > { %p521_p12 = scmp.ne.s32.totalorder %s514_s7, %s520_s8  ;;  %p526_p5 = scmp.lt.s32.totalorder %s524_s26, %s520_s8 }
  0x4b   : > { %p522_p0 = pnand %p521_p12, %p402_p4 }
  0x4d   : > { %p523_p3 = pneg %p522_p0 }
  0x4f   : > { %p528_p6 = pnand %p526_p5, %p523_p3 }
  0x51   : > { %531 = shalt.err (!%p528_p6)
}
  0x52   : > { %s532_s16 = sshra.s32 %s180_s3, 4  ;;  %s652_s6 = smov [#allocation5]   ;;  %s533_s16 = int_to_ptr.vmem [resolvable:$true] %s532_s16 }
  0x53   : > { %s539_s30 = scalar_lea.vmem %s533_s16, %s515_s5  ;;  %s543_s28 = scalar_lea.vmem %s652_s6, 4 }
  0x54   : > { %p540_p7 = scmp.ne.s32.totalorder %s533_s16, %s539_s30  ;;  %p545_p1 = scmp.lt.s32.totalorder %s543_s28, %s539_s30 }
  0x56   : > { %p541_p10 = pnand %p540_p7, %p402_p4 }
  0x58   : > { %p542_p13 = pneg %p541_p10 }
  0x5a   : > { %p547_p2 = pnand %p545_p1, %p542_p13 }
  0x5c   : > { %550 = shalt.err (!%p547_p2)
}
  0x5d   : > { %182 = dma.hbm_to_vmem [thread:$0]  (%p402_p4), %s178_s25, %s176_s20, %s180_s3, %s774_s29  }
  0x5e PF: > { %p403_p12 = scmp.ge.s32.totalorder %s649_s14, 1  ;;  %p184_p0 = scmp.lt.s32.totalorder %s649_s14, 3 }
  0x60   : > { %p185_p3 = pnand %p403_p12, %p184_p0 }
  0x61   : > { %s799_s19 = sand.u32 (!%p185_p3), 1, %s633_s10  }
  0x62   : > { %188 = sbr.rel (%p185_p3) target bundleno = 146 (0x92), region = 28  ;;  %s404_s4 = sshll.u32 (!%p185_p3), %s799_s19, 2 }
  0x63   : > { %s191_s18 = scalar_lea.sflag (!%p185_p3), [#allocation3], %s799_s19  ;;  %s194_s7 = scalar_lea.vmem (!%p185_p3), [#allocation2], %s404_s4 }
  0x67   : > { %616 = dma.done.wait (%p716_p8), %s191_s18, 64  }
  0x68   : > { %618 = vsyncadd (%p716_p8), %s191_s18, 4294967232  ;;  %s405_s27 = sshll.u32 %s799_s19, 1  ;;  %s201_s29 = scalar_lea.sflag [#allocation6], %s799_s19 }
  0x69   : > { %s204_s20 = scalar_lea.vmem [#allocation5], %s405_s27 }
  0x6a   : > { %620 = dma.done.wait (%p716_p8), %s201_s29, 32  }
  0x6b   : > { %622 = vsyncadd (%p716_p8), %s201_s29, 4294967264  ;;  %v246_v0 = vld [vmem:[%s204_s20] sm:$0x3]  ;;  %vm251_vm0 = vcmask 1041408   ;;  %v245_v3 = vld [vmem:[%s194_s7] sm:$0xf] }
  0x6c   : > { %v248_v1 = vperm.slane %v246_v0, 0  ;;  %v249_v2 = vperm.slane %v246_v0, 1  ;;  %s230_s25 = scalar_lea.vmem [#allocation7], %s404_s4  ;;  %s257_s3 = scalar_lea.sflag [#allocation4], %s799_s19 }
  0x6d   : > { %s408_s5 = sshll.u32 (%p720_p9), %s641_s12, 1 }
  0x6e   : > { %v250_v4 = vrot.slane %v249_v2, 6  ;;  %s265_s21 = ssub.s32 (%p720_p9), 3, %s408_s5 }
  0x6f   : > { %263 = sbr.rel (!%p720_p9) target bundleno = 146 (0x92), region = 40  ;;  %p266_p8 = scmp.lt.s32.totalorder (%p720_p9), %s265_s21, 2 }
  0x70   : > { %v252_v5 = vsel %vm251_vm0, %v248_v1, %v250_v4 }
  0x71   : > { %v254_v6 = vadd.f32 %v252_v5, %v245_v3 }
  0x73   : > { %255 = vst [vmem:[%s230_s25] sm:$0xf] %v254_v6 }
  0x74   : > { %s898_s21 = smov (!%p266_p8, %s265_s21), 2 }
  0x75   : > { %s409_s8 = sshll.u32 %s898_s21, 1 }
  0x76   : > { %s269_s15 = ssub.s32 4, %s409_s8 }
  0x77   : > { %s270_s17 = sshll.u32 %s269_s15, 4 }
  0x78   : > { %271 = vsyncadd %s257_s3, %s270_s17  ;;  %p822_p4 = scmp.ne.s32.totalorder %s409_s8, 0  ;;  %s417_s22 = sshll.u32 %s641_s12, 2 }
  0x79   : > { %s276_s6 = scalar_lea.hbm %s874_s2, %s417_s22  ;;  %s413_s28 = sshll.u32 %s898_s21, 5 }
  0x7a   : > { %s279_s4 = sshll.u32 %s230_s25, 4  ;;  %s281_s18 = sshll.u32 %s276_s6, 4  ;;  %s280_s4 = int_to_ptr.vmem [resolvable:$true] %s279_s4  ;;  %s282_s18 = int_to_ptr.hbm [resolvable:$true] %s281_s18 }
  0x7b   : > { %s552_s7 = sshra.s32 %s280_s4, 4  ;;  %s554_s27 = sshrl.u32 %s413_s28, 4  ;;  %s553_s7 = int_to_ptr.vmem [resolvable:$true] %s552_s7 }
  0x7c   : > { %s559_s29 = scalar_lea.vmem %s553_s7, %s554_s27  ;;  %s653_s20 = smov [#allocation7]  }
  0x7d   : > { %p560_p9 = scmp.ne.s32.totalorder %s553_s7, %s559_s29  ;;  %s563_s12 = scalar_lea.vmem %s653_s20, 8 }
  0x7e   : > { %p565_p7 = scmp.lt.s32.totalorder %s563_s12, %s559_s29 }
  0x7f   : > { %p561_p5 = pnand %p560_p9, %p822_p4 }
  0x81   : > { %p562_p6 = pneg %p561_p5 }
  0x83   : > { %p567_p10 = pnand %p565_p7, %p562_p6 }
  0x85   : > { %570 = shalt.err (!%p567_p10)
}
  0x86   : > { %s571_s5 = sshra.s32 %s282_s18, 4  ;;  %s582_s17 = scalar_lea.hbm %s874_s2, 6  ;;  %s572_s5 = int_to_ptr.hbm [resolvable:$true] %s571_s5 }
  0x87   : > { %s578_s25 = scalar_lea.hbm %s572_s5, %s554_s27  ;;  %p583_p12 = scmp.lt.s32.totalorder %s572_s5, %s874_s2 }
  0x88   : > { %p579_p13 = scmp.ne.s32.totalorder %s572_s5, %s578_s25  ;;  %p584_p0 = scmp.lt.s32.totalorder %s582_s17, %s578_s25 }
  0x8a   : > { %p580_p1 = pnand %p579_p13, %p822_p4  ;;  %p585_p3 = por %p584_p0, %p583_p12 }
  0x8c   : > { %p581_p2 = pneg %p580_p1 }
  0x8e   : > { %p586_p8 = pnand %p585_p3, %p581_p2 }
  0x90   : > { %589 = shalt.err (!%p586_p8)
}
  0x91   : > { %284 = dma.vmem_to_hbm [thread:$0]  (%p822_p4), %s280_s4, %s413_s28, %s282_s18, %s257_s3  }
  0x92 PF: > { %s293_s30 = sand.u32 1, %s629_s9   ;;  %p884_p9 = scmp.ge.s32.totalorder %s649_s14, 2 }
  0x93   : > { %s294_s6 = scalar_lea.sflag [#allocation4], %s293_s30 }
  0x94   : > { %p422_p5 = pnand %p884_p9, %p727_p11 }
  0x96   : > { %p423_p6 = pneg %p422_p5 }
  0x98   : > { %624 = dma.done.wait (%p423_p6), %s294_s6, 64  }
  0x99   : > { %626 = vsyncadd (%p423_p6), %s294_s6, 4294967232  ;;  %s21_s14 = sadd.s32 1, %s649_s14   ;;  %s885_s19 = sld [smem:[#allocation11_spill]] }
  0x9a   : > { %p18_p7 = scmp.ge.s32.totalorder %s21_s14, 4   ;;  %s886_s9 = smov %s633_s10 }
  0x9b   : > { %s887_s10 = smov %s637_s11  ;;  %s888_s11 = smov %s725_s23 }
  0x9c   : > { %s889_s12 = smov %s645_s13  ;;  %20 = sbr.rel (!%p18_p7) target bundleno = 8 (0x8), region = 86 }
  0x9f   : > { %s890_s13 = smov %s885_s19 }
  0xa1   :  { %300 = vsyncpa [#allocation3], 1 }
  0xa2   :  { %302 = vsyncpa [#allocation3 + $0x1], 1 }
  0xa3   :  { %303 = vsyncpa [#allocation6], 1 }
  0xa4   :  { %305 = vsyncpa [#allocation6 + $0x1], 1 }
  0xa5   :  { %306 = vsyncpa [#allocation4], 1 }
  0xa6   :  { %308 = vsyncpa [#allocation4 + $0x1], 1 }

</bundles_post_ra>
